<compile_context>
chip_gen: v6e
topology: v6e:2x2x1
jax: 0.10.0
libtpu: 0.0.40
codegen_flags: <defaults>
</compile_context>

<pallas_src>
import math

import jax
import jax.numpy as jnp
from jax.experimental import pallas as pl
from jax.experimental.pallas import tpu as pltpu


_SQRT_2_OVER_PI = 0.7978845608028654


def _gelu_tanh(x):
    # GPT-style gelu (tanh approximation), computed in f32.
    # TODO(synk): switch to erf-exact gelu if the reference `gelu` resolves to
    # torch.nn.functional.gelu(approximate="none").
    return 0.5 * x * (1.0 + jnp.tanh(_SQRT_2_OVER_PI * (x + 0.044715 * x * x * x)))


def _fused_sparse_mlp_kernel(x_ref, wu_ref, bu_ref, mask_ref, wd_ref, bd_ref,
                             o_ref, acc_ref):
    """One (token-tile i, intermediate-tile j) grid step.

    x_ref    : (tm, H)   activation tile
    wu_ref   : (H, ti)   up-proj weight tile   (torch weight.T)
    bu_ref   : (1, ti)   up-proj bias tile
    mask_ref : (1, ti)   sparsity mask tile
    wd_ref   : (ti, H)   down-proj weight tile (torch weight.T)
    bd_ref   : (1, H)    down-proj bias
    o_ref    : (tm, H)   output tile (resident across the j axis)
    acc_ref  : (tm, H)   f32 accumulator scratch
    """
    j = pl.program_id(1)

    @pl.when(j == 0)
    def _():
        acc_ref[...] = jnp.zeros_like(acc_ref)

    # Up-projection chunk on the MXU with f32 accumulation.
    h = jnp.dot(x_ref[...], wu_ref[...], preferred_element_type=jnp.float32)
    h = h + bu_ref[...].astype(jnp.float32)

    # gelu + training-mode sparsity mask (VPU/EUP, f32) — hidden under MXU slack.
    h = _gelu_tanh(h) * mask_ref[...].astype(jnp.float32)

    # Down-projection: accumulate over intermediate tiles (MXU inputs in the
    # weights' storage dtype -> bf16 MXU path if weights are bf16).
    acc_ref[...] += jnp.dot(h.astype(wd_ref.dtype), wd_ref[...],
                            preferred_element_type=jnp.float32)

    @pl.when(j == pl.num_programs(1) - 1)
    def _():
        o_ref[...] = (acc_ref[...] + bd_ref[...].astype(jnp.float32)).astype(o_ref.dtype)


def _divisor_candidates(dim, candidates):
    divs = [c for c in candidates if dim % c == 0]
    return divs if divs else [dim]  # full-extent block is always legal


def _vmem_bytes(tm, ti, H, dt_bytes):
    # Double-buffered pipeline inputs/outputs + f32 accumulator scratch.
    per_step = (tm * H          # x tile
                + H * ti        # w_up tile
                + ti            # b_up tile
                + ti            # mask tile
                + ti * H        # w_down tile
                + H             # b_down
                + tm * H)       # output tile
    return 2 * per_step * dt_bytes + tm * H * 4


def _choose_tiles(M, I, H, dt_bytes, budget):
    tm_cands = _divisor_candidates(M, (512, 256, 128, 64, 32, 16, 8))
    ti_cands = _divisor_candidates(I, (1024, 512, 256, 128))
    for tm in tm_cands:
        for ti in ti_cands:
            if _vmem_bytes(tm, ti, H, dt_bytes) <= budget:
                return tm, ti
    return tm_cands[-1], ti_cands[-1]


def gpt_sparse_mlp(x, w_up, b_up, w_down, b_down, mask, *, tm=None, ti=None):
    """Fused GptSparseMLP forward (training=True path).

    x      : (..., H)
    w_up   : (H, I)  == torch dense_h_to_4h.weight.T
    b_up   : (I,)
    w_down : (I, H)  == torch dense_4h_to_h.weight.T
    b_down : (H,)
    mask   : (I,)    per-intermediate-feature sparsity mask
    """
    orig_shape = x.shape
    H = orig_shape[-1]
    M = math.prod(orig_shape[:-1])
    I = w_up.shape[1]
    x2d = x.reshape(M, H)

    itemsize = jnp.dtype(x.dtype).itemsize
    vmem_limit = 48 * 1024 * 1024            # fits v7x 64 MiB physical VMEM
    auto_tm, auto_ti = _choose_tiles(M, I, H, itemsize, budget=40 * 1024 * 1024)
    tm = tm if tm is not None else auto_tm
    ti = ti if ti is not None else auto_ti
    grid = (M // tm, I // ti)

    cost = pl.CostEstimate(
        flops=4 * M * I * H,                 # two matmuls (2*M*I*H each)
        transcendentals=M * I,               # tanh in gelu
        bytes_accessed=int(itemsize * (x2d.size + w_up.size + w_down.size
                                       + b_up.size + b_down.size + mask.size
                                       + M * H)),
    )

    out2d = pl.pallas_call(
        _fused_sparse_mlp_kernel,
        out_shape=jax.ShapeDtypeStruct((M, H), x.dtype),
        grid_spec=pltpu.PrefetchScalarGridSpec(
            num_scalar_prefetch=0,
            grid=grid,
            in_specs=[
                pl.BlockSpec((tm, H), lambda i, j: (i, 0)),   # x
                pl.BlockSpec((H, ti), lambda i, j: (0, j)),   # w_up
                pl.BlockSpec((1, ti), lambda i, j: (0, j)),   # b_up
                pl.BlockSpec((1, ti), lambda i, j: (0, j)),   # mask
                pl.BlockSpec((ti, H), lambda i, j: (j, 0)),   # w_down
                pl.BlockSpec((1, H), lambda i, j: (0, 0)),    # b_down
            ],
            out_specs=pl.BlockSpec((tm, H), lambda i, j: (i, 0)),
            scratch_shapes=[pltpu.VMEM((tm, H), jnp.float32)],
        ),
        compiler_params=pltpu.CompilerParams(
            dimension_semantics=("parallel", "arbitrary"),
            vmem_limit_bytes=vmem_limit,
        ),
        cost_estimate=cost,
    )(x2d, w_up, b_up.reshape(1, I), mask.reshape(1, I), w_down,
      b_down.reshape(1, H))

    return out2d.reshape(orig_shape)


if __name__ == "__main__":
    B, S, H = 2, 8, 64
    I = 4 * H                                  # dense_h_to_4h: H -> 4H

    key = jax.random.PRNGKey(0)
    ks = jax.random.split(key, 6)
    init = lambda k, shape: (0.05 * jax.random.normal(k, shape)).astype(jnp.float32)

    # torch layout: weight is (out_features, in_features)
    w_up_t = init(ks[0], (I, H))               # dense_h_to_4h.weight
    b_up = init(ks[1], (I,))                   # dense_h_to_4h.bias
    w_down_t = init(ks[2], (H, I))             # dense_4h_to_h.weight
    b_down = init(ks[3], (H,))                 # dense_4h_to_h.bias
    # training-mode mask: ones with some pruned intermediate features
    mask = (jax.random.uniform(ks[4], (I,)) > 0.25).astype(jnp.float32)
    x = jax.random.normal(ks[5], (B, S, H), dtype=jnp.float32)

    fwd = jax.jit(lambda xx: gpt_sparse_mlp(
        xx, w_up_t.T, b_up, w_down_t.T, b_down, mask))
    out = fwd(x)
    jax.block_until_ready(out)

    # pure-JAX reference of the torch forward (training=True)
    ref = (_gelu_tanh(x.reshape(-1, H) @ w_up_t.T + b_up) * mask) @ w_down_t.T + b_down
    ref = ref.reshape(B, S, H)

    assert out.shape == (B, S, H) and out.dtype == jnp.float32
    max_err = float(jnp.max(jnp.abs(out - ref)))
    assert max_err < 1e-4, f"mismatch vs reference: {max_err}"
    print("KERNEL_OK")
</pallas_src>

<mosaic_0001>
module attributes {stable_mosaic.version = 11 : i64} {
  func.func @_fused_sparse_mlp_kernel(%arg0: i32, %arg1: i32, %arg2: memref<16x64xf32, #tpu.memory_space<vmem>>, %arg3: memref<64x256xf32, #tpu.memory_space<vmem>>, %arg4: memref<1x256xf32, #tpu.memory_space<vmem>>, %arg5: memref<1x256xf32, #tpu.memory_space<vmem>>, %arg6: memref<256x64xf32, #tpu.memory_space<vmem>>, %arg7: memref<1x64xf32, #tpu.memory_space<vmem>>, %arg8: memref<16x64xf32, #tpu.memory_space<vmem>>, %arg9: memref<16x64xf32, #tpu.memory_space<vmem>>) attributes {dimension_semantics = [#tpu.dimension_semantics<parallel>, #tpu.dimension_semantics<arbitrary>], iteration_bounds = array<i64: 1, 1>, scalar_prefetch = 0 : i64, scratch_operands = 1 : i64, tpu.core_type = #tpu.core_type<tc>, window_params = [{transform_indices = @transform_0, window_bounds = array<i64: 16, 64>}, {transform_indices = @transform_1, window_bounds = array<i64: 64, 256>}, {transform_indices = @transform_2, window_bounds = array<i64: 1, 256>}, {transform_indices = @transform_3, window_bounds = array<i64: 1, 256>}, {transform_indices = @transform_4, window_bounds = array<i64: 256, 64>}, {pipeline_mode = #tpu.pipeline_mode<synchronous>, transform_indices = @transform_5, window_bounds = array<i64: 1, 64>}, {transform_indices = @transform_6, window_bounds = array<i64: 16, 64>}]} {
    %c0_i32 = arith.constant 0 : i32
    %0 = arith.cmpi eq, %arg1, %c0_i32 : i32
    %1 = arith.extui %0 : i1 to i32
    %c0_i32_0 = arith.constant 0 : i32
    %2 = arith.cmpi ne, %1, %c0_i32_0 : i32
    scf.if %2 {
      %cst_21 = arith.constant 0.000000e+00 : f32
      %33 = vector.broadcast %cst_21 : f32 to vector<16x64xf32>
      %c0_22 = arith.constant 0 : index
      %c0_23 = arith.constant 0 : index
      %34 = vector.load %arg9[%c0_22, %c0_23] : memref<16x64xf32, #tpu.memory_space<vmem>>, vector<16x64xf32>
      tpu.vector_store %arg9[%c0_22, %c0_23], %33 {strides = array<i32>} : memref<16x64xf32, #tpu.memory_space<vmem>>, vector<16x64xf32>,
    } else {
    }
    %c0 = arith.constant 0 : index
    %c0_1 = arith.constant 0 : index
    %3 = vector.load %arg2[%c0, %c0_1] : memref<16x64xf32, #tpu.memory_space<vmem>>, vector<16x64xf32>
    %c0_2 = arith.constant 0 : index
    %c0_3 = arith.constant 0 : index
    %4 = vector.load %arg3[%c0_2, %c0_3] : memref<64x256xf32, #tpu.memory_space<vmem>>, vector<64x256xf32>
    %cst = arith.constant dense<0.000000e+00> : vector<16x256xf32>
    %5 = tpu.matmul %3, %4, %cst {dimension_numbers = #tpu.dot_dimension_numbers<[1], [0], [0], [1], [0, 0, 1, 1], [], []>} : vector<16x64xf32>, vector<64x256xf32>, vector<16x256xf32> -> vector<16x256xf32>
    %c0_4 = arith.constant 0 : index
    %c0_5 = arith.constant 0 : index
    %6 = vector.load %arg4[%c0_4, %c0_5] : memref<1x256xf32, #tpu.memory_space<vmem>>, vector<1x256xf32>
    %7 = vector.broadcast %6 : vector<1x256xf32> to vector<16x256xf32>
    %8 = arith.addf %5, %7 : vector<16x256xf32>
    %cst_6 = arith.constant 5.000000e-01 : f32
    %9 = vector.broadcast %cst_6 : f32 to vector<16x256xf32>
    %10 = arith.mulf %9, %8 : vector<16x256xf32>
    %cst_7 = arith.constant 4.471500e-02 : f32
    %11 = vector.broadcast %cst_7 : f32 to vector<16x256xf32>
    %12 = arith.mulf %11, %8 : vector<16x256xf32>
    %13 = arith.mulf %12, %8 : vector<16x256xf32>
    %14 = arith.mulf %13, %8 : vector<16x256xf32>
    %15 = arith.addf %8, %14 : vector<16x256xf32>
    %cst_8 = arith.constant 0.797884583 : f32
    %16 = vector.broadcast %cst_8 : f32 to vector<16x256xf32>
    %17 = arith.mulf %16, %15 : vector<16x256xf32>
    %18 = math.tanh %17 : vector<16x256xf32>
    %cst_9 = arith.constant 1.000000e+00 : f32
    %19 = vector.broadcast %cst_9 : f32 to vector<16x256xf32>
    %20 = arith.addf %19, %18 : vector<16x256xf32>
    %21 = arith.mulf %10, %20 : vector<16x256xf32>
    %c0_10 = arith.constant 0 : index
    %c0_11 = arith.constant 0 : index
    %22 = vector.load %arg5[%c0_10, %c0_11] : memref<1x256xf32, #tpu.memory_space<vmem>>, vector<1x256xf32>
    %23 = vector.broadcast %22 : vector<1x256xf32> to vector<16x256xf32>
    %24 = arith.mulf %21, %23 : vector<16x256xf32>
    %c0_12 = arith.constant 0 : index
    %c0_13 = arith.constant 0 : index
    %25 = vector.load %arg9[%c0_12, %c0_13] : memref<16x64xf32, #tpu.memory_space<vmem>>, vector<16x64xf32>
    %c0_14 = arith.constant 0 : index
    %c0_15 = arith.constant 0 : index
    %26 = vector.load %arg6[%c0_14, %c0_15] : memref<256x64xf32, #tpu.memory_space<vmem>>, vector<256x64xf32>
    %cst_16 = arith.constant dense<0.000000e+00> : vector<16x64xf32>
    %27 = tpu.matmul %24, %26, %cst_16 {dimension_numbers = #tpu.dot_dimension_numbers<[1], [0], [0], [1], [0, 0, 1, 1], [], []>} : vector<16x256xf32>, vector<256x64xf32>, vector<16x64xf32> -> vector<16x64xf32>
    %28 = arith.addf %25, %27 : vector<16x64xf32>
    %c0_17 = arith.constant 0 : index
    %c0_18 = arith.constant 0 : index
    %29 = vector.load %arg9[%c0_17, %c0_18] : memref<16x64xf32, #tpu.memory_space<vmem>>, vector<16x64xf32>
    tpu.vector_store %arg9[%c0_17, %c0_18], %28 {strides = array<i32>} : memref<16x64xf32, #tpu.memory_space<vmem>>, vector<16x64xf32>,
    %c0_i32_19 = arith.constant 0 : i32
    %30 = arith.cmpi eq, %arg1, %c0_i32_19 : i32
    %31 = arith.extui %30 : i1 to i32
    %c0_i32_20 = arith.constant 0 : i32
    %32 = arith.cmpi ne, %31, %c0_i32_20 : i32
    scf.if %32 {
      %c0_21 = arith.constant 0 : index
      %c0_22 = arith.constant 0 : index
      %33 = vector.load %arg9[%c0_21, %c0_22] : memref<16x64xf32, #tpu.memory_space<vmem>>, vector<16x64xf32>
      %c0_23 = arith.constant 0 : index
      %c0_24 = arith.constant 0 : index
      %34 = vector.load %arg7[%c0_23, %c0_24] : memref<1x64xf32, #tpu.memory_space<vmem>>, vector<1x64xf32>
      %35 = vector.broadcast %34 : vector<1x64xf32> to vector<16x64xf32>
      %36 = arith.addf %33, %35 : vector<16x64xf32>
      %c0_25 = arith.constant 0 : index
      %c0_26 = arith.constant 0 : index
      %37 = vector.load %arg8[%c0_25, %c0_26] : memref<16x64xf32, #tpu.memory_space<vmem>>, vector<16x64xf32>
      tpu.vector_store %arg8[%c0_25, %c0_26], %36 {strides = array<i32>} : memref<16x64xf32, #tpu.memory_space<vmem>>, vector<16x64xf32>,
    } else {
    }
    return
  }
  func.func @transform_0(%arg0: i32, %arg1: i32) -> (i32, i32) {
    %c0_i32 = arith.constant 0 : i32
    %c0_i32_0 = arith.constant 0 : i32
    return %arg0, %c0_i32 : i32, i32
  }
  func.func @transform_1(%arg0: i32, %arg1: i32) -> (i32, i32) {
    %c0_i32 = arith.constant 0 : i32
    %c0_i32_0 = arith.constant 0 : i32
    return %c0_i32, %arg1 : i32, i32
  }
  func.func @transform_2(%arg0: i32, %arg1: i32) -> (i32, i32) {
    %c0_i32 = arith.constant 0 : i32
    %c0_i32_0 = arith.constant 0 : i32
    return %c0_i32, %arg1 : i32, i32
  }
  func.func @transform_3(%arg0: i32, %arg1: i32) -> (i32, i32) {
    %c0_i32 = arith.constant 0 : i32
    %c0_i32_0 = arith.constant 0 : i32
    return %c0_i32, %arg1 : i32, i32
  }
  func.func @transform_4(%arg0: i32, %arg1: i32) -> (i32, i32) {
    %c0_i32 = arith.constant 0 : i32
    %c0_i32_0 = arith.constant 0 : i32
    return %arg1, %c0_i32 : i32, i32
  }
  func.func @transform_5(%arg0: i32, %arg1: i32) -> (i32, i32) {
    %c0_i32 = arith.constant 0 : i32
    %c0_i32_0 = arith.constant 0 : i32
    %c0_i32_1 = arith.constant 0 : i32
    return %c0_i32, %c0_i32_0 : i32, i32
  }
  func.func @transform_6(%arg0: i32, %arg1: i32) -> (i32, i32) {
    %c0_i32 = arith.constant 0 : i32
    %c0_i32_0 = arith.constant 0 : i32
    return %arg0, %c0_i32 : i32, i32
  }
}

</mosaic_0001>

<bundles_post_ra>
// kernel: _lambda_.1
= control target key start
LH: loop header
LB: loop body
LE: loop exit
PB: predicated region body
PF: predicated region fallthrough
CT: control target
= control target key end

     0   :  { %11 = vsyncpa [#allocation4], 0  ;;  %s611_s0 = inlined_call_operand.hbm [shape: f32[16,64], index: 0, kind: input, shape index: {}]   ;;  %s612_s1 = inlined_call_operand.hbm [shape: f32[64,256], index: 1, kind: input, shape index: {}]   ;;  %s613_s2 = inlined_call_operand.vmem [shape: f32[1,256], index: 2, kind: input, shape index: {}]   ;;  %s614_s3 = inlined_call_operand.vmem [shape: f32[1,256], index: 3, kind: input, shape index: {}]   ;;  %s615_s4 = inlined_call_operand.hbm [shape: f32[256,64], index: 4, kind: input, shape index: {}]   ;;  %s616_s5 = inlined_call_operand.vmem [shape: f32[1,64], index: 5, kind: input, shape index: {}]   ;;  %s617_s6 = inlined_call_operand.hbm [shape: f32[16,64], index: 6, kind: output, shape index: {}]  }
   0x1   :  { %12 = vsyncpa [#allocation7], 0 }
   0x2   :  { %13 = vsyncpa [#allocation5], 0  ;;  %s529_s21 = smov [#allocation6]  }
   0x3   :  { %s31_s22 = sshll.u32 %s529_s21, 4  ;;  %s32_s22 = int_to_ptr.vmem [resolvable:$true] %s31_s22 }
   0x4   :  { %s451_s23 = scalar_lea.vmem %s32_s22, 2048  ;;  %p456_p1 = scmp.lt.s32.totalorder %s32_s22, %s32_s22 }
   0x5   :  { %p452_p0 = scmp.ne.s32.totalorder %s32_s22, %s451_s23  ;;  %p457_p2 = scmp.lt.s32.totalorder %s451_s23, %s451_s23 }
   0x7   :  { %p458_p3 = por %p457_p2, %p456_p1 }
   0x9   :  { %p459_p4 = pnand %p458_p3, %p452_p0 }
   0xb   :  { %462 = shalt.err (!%p459_p4)
}
   0xc   :  { %s530_s24 = smov 256   ;;  %s531_s25 = smov 16  }
   0xd   :  { %37 = dma.hbm_to_vmem [thread:$0]  %s612_s1, 2048, %s32_s22, [#allocation7], %s530_s24, %s530_s24, %s531_s25  }
   0xe   :  { %s532_s28 = smov [#allocation3]  }
   0xf   :  { %s19_s29 = sshll.u32 %s532_s28, 4  ;;  %s20_s29 = int_to_ptr.vmem [resolvable:$true] %s19_s29 }
  0x10   :  { %s471_s30 = scalar_lea.vmem %s20_s29, 256  ;;  %p476_p6 = scmp.lt.s32.totalorder %s20_s29, %s20_s29 }
  0x11   :  { %p472_p5 = scmp.ne.s32.totalorder %s20_s29, %s471_s30  ;;  %p477_p7 = scmp.lt.s32.totalorder %s471_s30, %s471_s30 }
  0x13   :  { %p478_p8 = por %p477_p7, %p476_p6 }
  0x15   :  { %p479_p9 = pnand %p478_p8, %p472_p5 }
  0x17   :  { %482 = shalt.err (!%p479_p9)
}
  0x18   :  { %s533_s7 = smov 128   ;;  %s534_s8 = smov 8  }
  0x19   :  { %25 = dma.hbm_to_vmem [thread:$0]  %s611_s0, 256, %s20_s29, [#allocation4], %s533_s7, %s533_s7, %s534_s8  }
  0x1a   :  { %s535_s1 = smov [#allocation8]  }
  0x1b   :  { %s47_s11 = sshll.u32 %s535_s1, 4  ;;  %s48_s11 = int_to_ptr.vmem [resolvable:$true] %s47_s11 }
  0x1c   :  { %s491_s12 = scalar_lea.vmem %s48_s11, 4096  ;;  %p496_p11 = scmp.lt.s32.totalorder %s48_s11, %s48_s11 }
  0x1d   :  { %p492_p10 = scmp.ne.s32.totalorder %s48_s11, %s491_s12  ;;  %p497_p12 = scmp.lt.s32.totalorder %s491_s12, %s491_s12 }
  0x1f   :  { %p498_p13 = por %p497_p12, %p496_p11 }
  0x21   :  { %p499_p0 = pnand %p498_p13, %p492_p10 }
  0x23   :  { %502 = shalt.err (!%p499_p0)
}
  0x24   :  { %53 = dma.hbm_to_vmem [thread:$0]  %s615_s4, 4096, %s48_s11, [#allocation7], %s533_s7, %s533_s7, %s534_s8  }
  0x25   :  { %523 = dma.done.wait [#allocation4], 256  }
  0x26   :  { %524 = vsyncadd [#allocation4], 4294967040 }
  0x27   :  { %525 = dma.done.wait [#allocation7], 6144  }
  0x28   :  { %526 = vsyncadd [#allocation7], 4294961152  ;;  %vm69_vm0 = vcmask 523264   ;;  %v536_v0 = vmov 0.0   ;;  %v89_v1 = vld [vmem:[#allocation6 + $0x78] sm:$0xff]  ;;  %v88_v2 = vld [vmem:[#allocation6 + $0x70] sm:$0xff]  ;;  %v92_v51 = vlaneseq }
  0x29   :  { %70 = vst.msk [vmem:[#allocation2] sm:$0xff] %vm69_vm0, %v536_v0  ;;  %71 = vst.msk [vmem:[#allocation2 + $0x8] sm:$0xff] %vm69_vm0, %v536_v0  ;;  %173 = vmatprep.mubr.f32.mxu0 %v536_v0  ;;  %v87_v3 = vld [vmem:[#allocation6 + $0x68] sm:$0xff]  ;;  %125 = vmatprep.subr.mxu0 %v89_v1  ;;  %v86_v4 = vld [vmem:[#allocation6 + $0x60] sm:$0xff]  ;;  %s537_s17 = smov [#allocation9]  }
  0x2a   :  { %126 = vmatpush1.msra.mxu0 %v88_v2  ;;  %v85_v5 = vld [vmem:[#allocation6 + $0x58] sm:$0xff]  ;;  %v84_v6 = vld [vmem:[#allocation6 + $0x50] sm:$0xff]  ;;  %v83_v7 = vld [vmem:[#allocation6 + $0x48] sm:$0xff]  ;;  %v93_v52 = vshrl.u32 %v92_v51, 7  ;;  %s372_s18 = sshll.u32 %s537_s17, 4  ;;  %s373_s18 = int_to_ptr.vmem [resolvable:$true] %s372_s18 }
  0x2b   :  { %127 = vmatprep.subr.mxu0 %v87_v3  ;;  %v82_v8 = vld [vmem:[#allocation6 + $0x40] sm:$0xff]  ;;  %v81_v9 = vld [vmem:[#allocation6 + $0x38] sm:$0xff]  ;;  %v80_v10 = vld [vmem:[#allocation6 + $0x30] sm:$0xff]  ;;  %s503_s19 = scalar_lea.vmem %s373_s18, 256  ;;  %p508_p2 = scmp.lt.s32.totalorder %s373_s18, %s373_s18 }
  0x2c   :  { %128 = vmatpush1.msra.mxu0 %v86_v4  ;;  %v79_v11 = vld [vmem:[#allocation6 + $0x28] sm:$0xff]  ;;  %v78_v12 = vld [vmem:[#allocation6 + $0x20] sm:$0xff]  ;;  %v77_v13 = vld [vmem:[#allocation6 + $0x18] sm:$0xff]  ;;  %v94_v53 = vsub.s32 0, %v93_v52  ;;  %v98_v55 = vsub.s32 1, %v93_v52  ;;  %p504_p1 = scmp.ne.s32.totalorder %s373_s18, %s503_s19  ;;  %p509_p3 = scmp.lt.s32.totalorder %s503_s19, %s503_s19 }
  0x2d   :  { %129 = vmatprep.subr.mxu0 %v85_v5  ;;  %v76_v14 = vld [vmem:[#allocation6 + $0x10] sm:$0xff]  ;;  %v75_v15 = vld [vmem:[#allocation6 + $0x8] sm:$0xff]  ;;  %v74_v16 = vld [vmem:[#allocation6] sm:$0xff] }
  0x2e   :  { %130 = vmatpush1.msra.mxu0 %v84_v6  ;;  %v72_v17 = vld [vmem:[#allocation3] sm:$0xff]  ;;  %v73_v18 = vld [vmem:[#allocation3 + $0x8] sm:$0xff]  ;;  %v269_v23 = vld [vmem:[#allocation8 + $0xe8] sm:$0xff]  ;;  %p510_p4 = por %p509_p3, %p508_p2 }
  0x2f   :  { %131 = vmatprep.subr.mxu0 %v83_v7  ;;  %v271_v19 = vld [vmem:[#allocation8 + $0xf8] sm:$0xff]  ;;  %v270_v21 = vld [vmem:[#allocation8 + $0xf0] sm:$0xff]  ;;  %v253_v24 = vld [vmem:[#allocation8 + $0x68] sm:$0xff] }
  0x30   :  { %132 = vmatpush1.msra.mxu0 %v82_v8  ;;  %388 = vmatprep.subr.mxu1 %v271_v19  ;;  %v255_v20 = vld [vmem:[#allocation8 + $0x78] sm:$0xff]  ;;  %v254_v22 = vld [vmem:[#allocation8 + $0x70] sm:$0xff]  ;;  %v268_v25 = vld [vmem:[#allocation8 + $0xe0] sm:$0xff]  ;;  %p511_p5 = pnand %p510_p4, %p504_p1 }
  0x31   :  { %133 = vmatprep.subr.mxu0 %v81_v9  ;;  %389 = vmatpush3.msra.mxu1 %v255_v20  ;;  %v252_v26 = vld [vmem:[#allocation8 + $0x60] sm:$0xff]  ;;  %v267_v27 = vld [vmem:[#allocation8 + $0xd8] sm:$0xff]  ;;  %v266_v29 = vld [vmem:[#allocation8 + $0xd0] sm:$0xff] }
  0x32   :  { %134 = vmatpush1.msra.mxu0 %v80_v10  ;;  %390 = vmatprep.subr.mxu1 %v270_v21  ;;  %v251_v28 = vld [vmem:[#allocation8 + $0x58] sm:$0xff]  ;;  %v250_v30 = vld [vmem:[#allocation8 + $0x50] sm:$0xff]  ;;  %v265_v31 = vld [vmem:[#allocation8 + $0xc8] sm:$0xff] }
  0x33   :  { %135 = vmatprep.subr.mxu0 %v79_v11  ;;  %391 = vmatpush3.msra.mxu1 %v254_v22  ;;  %v249_v32 = vld [vmem:[#allocation8 + $0x48] sm:$0xff]  ;;  %v264_v33 = vld [vmem:[#allocation8 + $0xc0] sm:$0xff]  ;;  %v263_v35 = vld [vmem:[#allocation8 + $0xb8] sm:$0xff] }
  0x34   :  { %136 = vmatpush1.msra.mxu0 %v78_v12  ;;  %392 = vmatprep.subr.mxu1 %v269_v23  ;;  %v248_v34 = vld [vmem:[#allocation8 + $0x40] sm:$0xff]  ;;  %v247_v36 = vld [vmem:[#allocation8 + $0x38] sm:$0xff]  ;;  %v262_v37 = vld [vmem:[#allocation8 + $0xb0] sm:$0xff] }
  0x35   :  { %137 = vmatprep.subr.mxu0 %v77_v13  ;;  %393 = vmatpush3.msra.mxu1 %v253_v24  ;;  %v246_v38 = vld [vmem:[#allocation8 + $0x30] sm:$0xff]  ;;  %v261_v39 = vld [vmem:[#allocation8 + $0xa8] sm:$0xff]  ;;  %v260_v41 = vld [vmem:[#allocation8 + $0xa0] sm:$0xff] }
  0x36   :  { %138 = vmatpush1.msra.mxu0 %v76_v14  ;;  %394 = vmatprep.subr.mxu1 %v268_v25  ;;  %v245_v40 = vld [vmem:[#allocation8 + $0x28] sm:$0xff]  ;;  %v244_v42 = vld [vmem:[#allocation8 + $0x20] sm:$0xff]  ;;  %v259_v43 = vld [vmem:[#allocation8 + $0x98] sm:$0xff] }
  0x37   :  { %139 = vmatprep.subr.mxu0 %v75_v15  ;;  %395 = vmatpush3.msra.mxu1 %v252_v26  ;;  %v243_v44 = vld [vmem:[#allocation8 + $0x18] sm:$0xff]  ;;  %v258_v45 = vld [vmem:[#allocation8 + $0x90] sm:$0xff]  ;;  %v257_v47 = vld [vmem:[#allocation8 + $0x88] sm:$0xff] }
  0x38   :  { %140 = vmatpush1.msra.mxu0 %v74_v16  ;;  %396 = vmatprep.subr.mxu1 %v267_v27  ;;  %v242_v46 = vld [vmem:[#allocation8 + $0x10] sm:$0xff]  ;;  %v241_v48 = vld [vmem:[#allocation8 + $0x8] sm:$0xff]  ;;  %v256_v49 = vld [vmem:[#allocation8 + $0x80] sm:$0xff] }
  0x39   :  { %385 = vmatmul.mubr.msk.f32.vlgmr.msra.gmra.mxu0 %vm69_vm0, %v72_v17  ;;  %397 = vmatpush3.msra.mxu1 %v251_v28  ;;  %v240_v50 = vld [vmem:[#allocation8] sm:$0xff]  ;;  %v239_v51 = vld [vmem:[#allocation2 + $0x8] sm:$0xff] }
  0x3a   :  { %179 = vmatprep.mubr.f32.mxu0 %v536_v0  ;;  %398 = vmatprep.subr.mxu1 %v266_v29  ;;  %v90_v54 = vld [vmem:[%s613_s2] sm:$0x3] }
  0x3b   :  { %399 = vmatpush3.msra.mxu1 %v250_v30  ;;  %v95_v56 = vrot.slane %v90_v54, %v94_v53  ;;  %v99_v57 = vrot.slane %v90_v54, %v98_v55  ;;  %v222_v23 = vld [vmem:[%s614_s3] sm:$0x3] }
  0x3c   :  { %400 = vmatprep.subr.mxu1 %v265_v31  ;;  %v231_v29 = vrot.slane %v222_v23, %v98_v55  ;;  %v227_v31 = vrot.slane %v222_v23, %v94_v53  ;;  %v387_v55 = vld [vmem:[%s616_s5] ss:$0 sm:$0xff] }
  0x3d   :  { %386 = vmatmul.mubr.msk.f32.gmra.mxu0 %vm69_vm0, %v73_v18  ;;  %401 = vmatpush3.msra.mxu1 %v249_v32 }
  0x3e   :  { %402 = vmatprep.subr.mxu1 %v264_v33 }
  0x3f   :  { %403 = vmatpush3.msra.mxu1 %v248_v34 }
  0x40   :  { %404 = vmatprep.subr.mxu1 %v263_v35 }
  0x41   :  { %405 = vmatpush3.msra.mxu1 %v247_v36 }
  0x42   :  { %406 = vmatprep.subr.mxu1 %v262_v37 }
  0x43   :  { %407 = vmatpush3.msra.mxu1 %v246_v38 }
  0x44   :  { %408 = vmatprep.subr.mxu1 %v261_v39 }
  0x45   :  { %409 = vmatpush3.msra.mxu1 %v245_v40 }
  0x46   :  { %410 = vmatprep.subr.mxu1 %v260_v41 }
  0x47   :  { %411 = vmatpush3.msra.mxu1 %v244_v42 }
  0x48   :  { %412 = vmatprep.subr.mxu1 %v259_v43 }
  0x49   :  { %413 = vmatpush3.msra.mxu1 %v243_v44 }
  0x4a   :  { %414 = vmatprep.subr.mxu1 %v258_v45 }
  0x4b   :  { %415 = vmatpush3.msra.mxu1 %v242_v46  ;;  %v238_v46 = vld [vmem:[#allocation2] sm:$0xff] }
  0x4c   :  { %416 = vmatprep.subr.mxu1 %v257_v47 }
  0x4d   :  { %417 = vmatpush3.msra.mxu1 %v241_v48 }
  0x4e   :  { %418 = vmatprep.subr.mxu1 %v256_v49 }
  0x4f   :  { %419 = vmatpush3.msra.mxu1 %v240_v50 }
  0xf9   :  { %v175_v58 = vpop.f32.mrf.mxu0 }
  0xfa   :  { %v176_v59 = vadd.f32 %v175_v58, %v95_v56 }
  0xfb   :  { %v177_v60 = vpop.f32.mrf.mxu0 }
  0xfc   :  { %v190_v61 = vmul.f32 0.044715, %v176_v59  ;;  %v178_v62 = vadd.f32 %v177_v60, %v99_v57  ;;  %v186_v26 = vmul.f32 0.5, %v176_v59 }
  0xfd   :  { %v181_v63 = vpop.f32.mrf.mxu0 }
  0xfe   :  { %v194_v0 = vmul.f32 %v190_v61, %v176_v59  ;;  %v191_v1 = vmul.f32 0.044715, %v178_v62  ;;  %v182_v2 = vadd.f32 %v181_v63, %v95_v56  ;;  %v187_v27 = vmul.f32 0.5, %v178_v62 }
  0xff   :  { %v183_v3 = vpop.f32.mrf.mxu0 }
 0x100   :  { %v198_v4 = vmul.f32 %v194_v0, %v176_v59  ;;  %v192_v5 = vmul.f32 0.044715, %v182_v2  ;;  %v184_v6 = vadd.f32 %v183_v3, %v99_v57  ;;  %v195_v7 = vmul.f32 %v191_v1, %v178_v62 }
 0x101   :  { %v188_v36 = vmul.f32 0.5, %v182_v2 }
 0x102   :  { %v196_v8 = vmul.f32 %v192_v5, %v182_v2  ;;  %v193_v9 = vmul.f32 0.044715, %v184_v6  ;;  %v199_v10 = vmul.f32 %v195_v7, %v178_v62  ;;  %v202_v11 = vadd.f32 %v198_v4, %v176_v59 }
 0x103   :  { %v189_v38 = vmul.f32 0.5, %v184_v6 }
 0x104   :  { %v200_v12 = vmul.f32 %v196_v8, %v182_v2  ;;  %v197_v13 = vmul.f32 %v193_v9, %v184_v6  ;;  %v203_v14 = vadd.f32 %v199_v10, %v178_v62  ;;  %v206_v15 = vmul.f32 0.7978846, %v202_v11 }
 0x106   :  { %v201_v16 = vmul.f32 %v197_v13, %v184_v6  ;;  %v207_v17 = vmul.f32 0.7978846, %v203_v14  ;;  %435 = vtanh.f32 %v206_v15  ;;  %v204_v18 = vadd.f32 %v200_v12, %v182_v2 }
 0x108   :  { %437 = vtanh.f32 %v207_v17  ;;  %v205_v19 = vadd.f32 %v201_v16, %v184_v6  ;;  %v208_v20 = vmul.f32 0.7978846, %v204_v18 }
 0x10a   :  { %v209_v21 = vmul.f32 0.7978846, %v205_v19  ;;  %439 = vtanh.f32 %v208_v20 }
 0x10c   :  { %441 = vtanh.f32 %v209_v21 }
 0x113   :  { %v436_v22 = vpop.eup %435 }
 0x114   :  { %v214_v24 = vadd.f32 1.0, %v436_v22 }
 0x115   :  { %v438_v25 = vpop.eup %437 }
 0x116   :  { %v215_v28 = vadd.f32 1.0, %v438_v25  ;;  %v218_v32 = vmul.f32 %v214_v24, %v186_v26 }
 0x117   :  { %v440_v30 = vpop.eup %439 }
 0x118   :  { %v219_v33 = vmul.f32 %v215_v28, %v187_v27  ;;  %v216_v34 = vadd.f32 1.0, %v440_v30  ;;  %v234_v40 = vmul.f32 %v227_v31, %v218_v32 }
 0x119   :  { %v442_v35 = vpop.eup %441 }
 0x11a   :  { %v235_v37 = vmul.f32 %v231_v29, %v219_v33  ;;  %v217_v39 = vadd.f32 1.0, %v442_v35  ;;  %v220_v41 = vmul.f32 %v216_v34, %v188_v36 }
 0x11c   :  { %336 = vmatprep.mubr.f32.mxu1 %v235_v37  ;;  %v221_v42 = vmul.f32 %v217_v39, %v189_v38  ;;  %v236_v44 = vmul.f32 %v227_v31, %v220_v41 }
 0x11d   :  { %337 = vmatmul.mubr.f32.vlgmr.msra.gmra.mxu1 %v234_v40 }
 0x11e   :  { %v237_v43 = vmul.f32 %v231_v29, %v221_v42 }
 0x120   :  { %341 = vmatprep.mubr.f32.mxu1 %v237_v43 }
 0x121   :  { %342 = vmatmul.mubr.f32.gmra.mxu1 %v236_v44 }
 0x1dd   :  { %v420_v45 = vpop.f32.mrf.mxu1 }
 0x1df   :  { %v421_v47 = vpop.f32.mrf.mxu1 }
 0x1e0   :  { %v422_v48 = vadd.f32 %v421_v47, %v420_v45 }
 0x1e1   :  { %v423_v49 = vpop.f32.mrf.mxu1 }
 0x1e2   :  { %v347_v50 = vadd.f32 %v422_v48, %v238_v46 }
 0x1e3   :  { %v424_v52 = vpop.f32.mrf.mxu1 }
 0x1e4   :  { %349 = vst.msk [vmem:[#allocation2] sm:$0xff] %vm69_vm0, %v347_v50  ;;  %v425_v53 = vadd.f32 %v424_v52, %v423_v49 }
 0x1e6   :  { %v348_v54 = vadd.f32 %v425_v53, %v239_v51 }
 0x1e8   :  { %350 = vst.msk [vmem:[#allocation2 + $0x8] sm:$0xff] %vm69_vm0, %v348_v54 }
 0x1eb   :  { %v354_v56 = vld [vmem:[#allocation2] sm:$0xff] }
 0x1ec   :  { %v363_v57 = vadd.f32 %v387_v55, %v354_v56 }
 0x1ee   :  { %365 = vst.msk [vmem:[#allocation9] sm:$0xff] %vm69_vm0, %v363_v57 }
 0x1ef   :  { %v355_v58 = vld [vmem:[#allocation2 + $0x8] sm:$0xff] }
 0x1f0   :  { %v364_v59 = vadd.f32 %v387_v55, %v355_v58 }
 0x1f2   :  { %366 = vst.msk [vmem:[#allocation9 + $0x8] sm:$0xff] %vm69_vm0, %v364_v59 }
 0x1f3   :  { %514 = shalt.err (!%p511_p5)
}
 0x1f4   :  { %378 = dma.vmem_to_hbm [thread:$0]  %s373_s18, 256, %s617_s6, [#allocation5], %s533_s7, %s533_s7, %s534_s8  }
 0x1f5   :  { %527 = dma.done.wait [#allocation5], 256  }
 0x1f6   :  { %528 = vsyncadd [#allocation5], 4294967040 }
 0x1f7   :  { %382 = vsyncpa [#allocation4], 1 }
 0x1f8   :  { %383 = vsyncpa [#allocation7], 1 }
 0x1f9   :  { %384 = vsyncpa [#allocation5], 1 }

</bundles_post_ra>
